<compile_context>
chip_gen: v6e
topology: v6e:2x2x1
jax: 0.10.0
libtpu: 0.0.40
codegen_flags: <defaults>
</compile_context>

<pallas_src>
import functools

import jax
import jax.numpy as jnp
from jax import lax
from jax.experimental import pallas as pl
from jax.experimental.pallas import tpu as pltpu

EPS = 1e-5


def _stats_z_kernel(x_ref, w1_ref, slab_ref, gb2_ref, z_ref, coef2_ref,
                    acc1_ref, acc2_ref, coef1_ref, *, n_rows, blk):
    """Grid = (2 passes, num_blocks). Pass 0: BN1 stats. Pass 1: z + BN2 stats."""
    p = pl.program_id(0)            # pass index
    j = pl.program_id(1)            # batch-block index
    nb = pl.num_programs(1)
    inv_n = 1.0 / n_rows            # true batch size, not padded/block count

    @pl.when((p == 0) & (j == 0))
    def _init():
        acc1_ref[...] = jnp.zeros_like(acc1_ref)
        acc2_ref[...] = jnp.zeros_like(acc2_ref)

    # Linear(8 -> 10) on this block, produced directly in feature-major (10, blk) by
    # contracting the minor dims -- no transpose of x anywhere (wrapper or kernel).
    # Linear bias omitted: it cancels exactly under train-mode BatchNorm.
    h = lax.dot_general(w1_ref[...], x_ref[...],
                        (((1,), (1,)), ((), ())),
                        preferred_element_type=jnp.float32)               # (10, blk)

    # Valid-lane mask for the (possibly ragged) last block.
    col = lax.broadcasted_iota(jnp.int32, (1, blk), 1) + j * blk
    valid = col < n_rows                                                  # (1, blk)

    @pl.when(p == 0)
    def _accumulate_bn1():
        hm = jnp.where(valid, h, 0.0)
        acc1_ref[:, 0:1] += jnp.sum(hm, axis=1, keepdims=True)
        acc1_ref[:, 1:2] += jnp.sum(hm * hm, axis=1, keepdims=True)

    @pl.when((p == 1) & (j == 0))
    def _finalize_bn1():
        # Fold BN1 into one per-feature FMA, computed once and kept in scratch so it is
        # not re-derived (or re-broadcast from HBM params) on every block of pass 1.
        mu1 = acc1_ref[:, 0:1] * inv_n
        var1 = jnp.maximum(acc1_ref[:, 1:2] * inv_n - mu1 * mu1, 0.0)     # clamp
        s1 = slab_ref[:, 0:1] * lax.rsqrt(var1 + EPS)                     # gamma1*inv_std
        coef1_ref[:, 0:1] = s1
        coef1_ref[:, 1:2] = slab_ref[:, 1:2] - mu1 * s1                   # beta1 - mu1*s1

    @pl.when(p == 1)
    def _compute_z():
        y = jnp.maximum(h * coef1_ref[:, 0:1] + coef1_ref[:, 1:2], 0.0)   # BN1 + ReLU
        # Linear(10 -> 1): VPU multiply + sublane reduce (no MXU for one useful column).
        z = jnp.sum(y * slab_ref[:, 2:3], axis=0, keepdims=True)          # (1, blk)
        z_ref[...] = z                                                    # lane-dense store
        zm = jnp.where(valid, z, 0.0)
        acc2_ref[:, 0:1] += jnp.sum(zm, axis=1, keepdims=True)
        acc2_ref[:, 1:2] += jnp.sum(zm * zm, axis=1, keepdims=True)

    @pl.when((p == 1) & (j == nb - 1))
    def _finalize_bn2():
        mu2 = acc2_ref[:, 0:1] * inv_n
        var2 = jnp.maximum(acc2_ref[:, 1:2] * inv_n - mu2 * mu2, 0.0)     # clamp
        s2 = gb2_ref[:, 0:1] * lax.rsqrt(var2 + EPS)
        coef2_ref[:, 0:1] = s2
        coef2_ref[:, 1:2] = gb2_ref[:, 1:2] - mu2 * s2


def _sigmoid_kernel(coef2_ref, z_ref, o_ref):
    """Finalize pass: out = sigmoid(z * s2 + t2), lane-dense blocks, fully parallel."""
    o_ref[...] = jax.nn.sigmoid(z_ref[...] * coef2_ref[:, 0:1] + coef2_ref[:, 1:2])


@functools.partial(jax.jit, static_argnames=("blk",))
def net_forward(x, params, *, blk=256):
    """x: (N, 8) float32 -> (N, 1) float32 (training-mode BatchNorm semantics)."""
    n = x.shape[0]
    nb = pl.cdiv(n, blk)

    w1 = params["w1"].astype(jnp.float32)                                   # (10, 8)
    slab = jnp.stack([params["g1"], params["be1"],
                      params["w2"].reshape(10)], axis=1).astype(jnp.float32)  # (10, 3)
    gb2 = jnp.stack([params["g2"], params["be2"]]).reshape(1, 2).astype(jnp.float32)

    kernel1 = functools.partial(_stats_z_kernel, n_rows=n, blk=blk)
    z, coef2 = pl.pallas_call(
        kernel1,
        out_shape=(jax.ShapeDtypeStruct((1, n), jnp.float32),     # z (transposed, lane-dense)
                   jax.ShapeDtypeStruct((1, 2), jnp.float32)),    # [s2, t2]
        grid=(2, nb),
        in_specs=[
            pl.BlockSpec((blk, 8), lambda p, j: (j, 0)),   # x streamed in native layout
            pl.BlockSpec((10, 8), lambda p, j: (0, 0)),    # w1 resident
            pl.BlockSpec((10, 3), lambda p, j: (0, 0)),    # [gamma1 | beta1 | w2row] resident
            pl.BlockSpec((1, 2), lambda p, j: (0, 0)),     # [gamma2, beta2] resident
        ],
        out_specs=(
            # Pass 0 never writes z; park its block index at 0 (p*j == 0) so the only
            # z writebacks are the real ones in pass 1.
            pl.BlockSpec((1, blk), lambda p, j: (0, p * j)),
            pl.BlockSpec((1, 2), lambda p, j: (0, 0)),
        ),
        scratch_shapes=[
            pltpu.VMEM((10, 2), jnp.float32),   # BN1 accum [sum(h) | sum(h*h)]
            pltpu.VMEM((1, 2), jnp.float32),    # BN2 accum [sum(z) | sum(z*z)]
            pltpu.VMEM((10, 2), jnp.float32),   # folded BN1 [s1 | t1]
        ],
        compiler_params=pltpu.CompilerParams(
            # Global-stats accumulation -> sequential grid (TODO(synk): megacore split).
            dimension_semantics=("arbitrary", "arbitrary"),
            vmem_limit_bytes=32 * 1024 * 1024),
    )(x, w1, slab, gb2)

    out_t = pl.pallas_call(
        _sigmoid_kernel,
        out_shape=jax.ShapeDtypeStruct((1, n), jnp.float32),
        grid=(nb,),
        in_specs=[pl.BlockSpec((1, 2), lambda j: (0, 0)),
                  pl.BlockSpec((1, blk), lambda j: (0, j))],
        out_specs=pl.BlockSpec((1, blk), lambda j: (0, j)),
        compiler_params=pltpu.CompilerParams(
            dimension_semantics=("parallel",),
            vmem_limit_bytes=32 * 1024 * 1024),
    )(coef2, z)

    return out_t.reshape(n, 1)          # (1, N) -> (N, 1) is a metadata-only reshape


def init_params(key):
    """Deterministic init mirroring PyTorch defaults (weights only; Linear biases cancel)."""
    k1, k2 = jax.random.split(key, 2)
    bound1 = 1.0 / jnp.sqrt(8.0)
    bound2 = 1.0 / jnp.sqrt(10.0)
    return dict(
        w1=jax.random.uniform(k1, (10, 8), jnp.float32, -bound1, bound1),  # (out, in)
        g1=jnp.ones((10,), jnp.float32),       # BatchNorm1d(10) weight
        be1=jnp.zeros((10,), jnp.float32),     # BatchNorm1d(10) bias
        w2=jax.random.uniform(k2, (1, 10), jnp.float32, -bound2, bound2),  # (out, in)
        g2=jnp.ones((), jnp.float32),          # BatchNorm1d(1) weight
        be2=jnp.zeros((), jnp.float32),        # BatchNorm1d(1) bias
    )


def net_forward_ref(x, params, b1, b2):
    """Pure-JAX reference of the *full* PyTorch forward (including Linear biases)."""
    h = x @ params["w1"].T + b1
    mu1 = h.mean(0, keepdims=True)
    var1 = ((h - mu1) ** 2).mean(0, keepdims=True)
    h = (h - mu1) / jnp.sqrt(var1 + EPS) * params["g1"] + params["be1"]
    h = jnp.maximum(h, 0.0)
    z = h @ params["w2"].T + b2
    mu2 = z.mean(0, keepdims=True)
    var2 = ((z - mu2) ** 2).mean(0, keepdims=True)
    z = (z - mu2) / jnp.sqrt(var2 + EPS) * params["g2"] + params["be2"]
    return jax.nn.sigmoid(z)


if __name__ == "__main__":
    key = jax.random.PRNGKey(0)
    kx, kp, kb1, kb2 = jax.random.split(key, 4)

    # 700 rows, matching the 0:700 slice in the original script; with blk=256 this gives
    # a 3-block grid with a ragged last block, exercising the masked-stats path.
    n = 700
    x = jax.random.uniform(kx, (n, 8), jnp.float32, 0.0, 1.0)
    params = init_params(kp)

    # Random Linear biases: used ONLY by the reference, to demonstrate that dropping them
    # in the kernel is exact (bias before train-mode BatchNorm cancels in h - mean).
    b1 = jax.random.uniform(kb1, (10,), jnp.float32, -1.0 / jnp.sqrt(8.0), 1.0 / jnp.sqrt(8.0))
    b2 = jax.random.uniform(kb2, (1,), jnp.float32, -1.0 / jnp.sqrt(10.0), 1.0 / jnp.sqrt(10.0))

    out = jax.block_until_ready(net_forward(x, params, blk=256))
    ref = net_forward_ref(x, params, b1, b2)

    assert out.shape == (n, 1)
    max_err = float(jnp.max(jnp.abs(out - ref)))
    assert jnp.allclose(out, ref, atol=1e-4, rtol=1e-4), f"max abs err {max_err}"

    print("KERNEL_OK")
</pallas_src>

<mosaic_0001>
module attributes {stable_mosaic.version = 11 : i64} {
  func.func @_sigmoid_kernel(%arg0: i32, %arg1: memref<1x2xf32, #tpu.memory_space<vmem>>, %arg2: memref<1x256xf32, #tpu.memory_space<vmem>>, %arg3: memref<1x256xf32, #tpu.memory_space<vmem>>) attributes {dimension_semantics = [#tpu.dimension_semantics<parallel>], iteration_bounds = array<i64: 3>, scalar_prefetch = 0 : i64, scratch_operands = 0 : i64, tpu.core_type = #tpu.core_type<tc>, window_params = [{pipeline_mode = #tpu.pipeline_mode<synchronous>, transform_indices = @transform_0, window_bounds = array<i64: 1, 2>}, {transform_indices = @transform_1, window_bounds = array<i64: 1, 256>}, {transform_indices = @transform_2, window_bounds = array<i64: 1, 256>}]} {
    %c0 = arith.constant 0 : index
    %c0_0 = arith.constant 0 : index
    %0 = vector.load %arg2[%c0, %c0_0] : memref<1x256xf32, #tpu.memory_space<vmem>>, vector<1x256xf32>
    %c0_1 = arith.constant 0 : index
    %c0_2 = arith.constant 0 : index
    %1 = vector.load %arg1[%c0_1, %c0_2] : memref<1x2xf32, #tpu.memory_space<vmem>>, vector<1x1xf32>
    %2 = vector.broadcast %1 : vector<1x1xf32> to vector<1x256xf32>
    %3 = arith.mulf %0, %2 : vector<1x256xf32>
    %c0_3 = arith.constant 0 : index
    %c1 = arith.constant 1 : index
    %4 = vector.load %arg1[%c0_3, %c1] : memref<1x2xf32, #tpu.memory_space<vmem>>, vector<1x1xf32>
    %5 = vector.broadcast %4 : vector<1x1xf32> to vector<1x256xf32>
    %6 = arith.addf %3, %5 : vector<1x256xf32>
    %7 = arith.negf %6 : vector<1x256xf32>
    %8 = math.exp %7 : vector<1x256xf32>
    %cst = arith.constant 1.000000e+00 : f32
    %9 = vector.broadcast %cst : f32 to vector<1x256xf32>
    %10 = arith.addf %9, %8 : vector<1x256xf32>
    %11 = arith.divf %9, %10 : vector<1x256xf32>
    %c0_4 = arith.constant 0 : index
    %c0_5 = arith.constant 0 : index
    %12 = vector.load %arg3[%c0_4, %c0_5] : memref<1x256xf32, #tpu.memory_space<vmem>>, vector<1x256xf32>
    tpu.vector_store %arg3[%c0_4, %c0_5], %11 {strides = array<i32>} : memref<1x256xf32, #tpu.memory_space<vmem>>, vector<1x256xf32>,
    return
  }
  func.func @transform_0(%arg0: i32) -> (i32, i32) {
    %c0_i32 = arith.constant 0 : i32
    %c0_i32_0 = arith.constant 0 : i32
    %c0_i32_1 = arith.constant 0 : i32
    return %c0_i32, %c0_i32_0 : i32, i32
  }
  func.func @transform_1(%arg0: i32) -> (i32, i32) {
    %c0_i32 = arith.constant 0 : i32
    %c0_i32_0 = arith.constant 0 : i32
    return %c0_i32, %arg0 : i32, i32
  }
  func.func @transform_2(%arg0: i32) -> (i32, i32) {
    %c0_i32 = arith.constant 0 : i32
    %c0_i32_0 = arith.constant 0 : i32
    return %c0_i32, %arg0 : i32, i32
  }
}

module attributes {stable_mosaic.version = 11 : i64} {
  func.func @_stats_z_kernel(%arg0: i32, %arg1: i32, %arg2: memref<256x8xf32, #tpu.memory_space<vmem>>, %arg3: memref<10x8xf32, #tpu.memory_space<vmem>>, %arg4: memref<10x3xf32, #tpu.memory_space<vmem>>, %arg5: memref<1x2xf32, #tpu.memory_space<vmem>>, %arg6: memref<1x256xf32, #tpu.memory_space<vmem>>, %arg7: memref<1x2xf32, #tpu.memory_space<vmem>>, %arg8: memref<10x2xf32, #tpu.memory_space<vmem>>, %arg9: memref<1x2xf32, #tpu.memory_space<vmem>>, %arg10: memref<10x2xf32, #tpu.memory_space<vmem>>) attributes {dimension_semantics = [#tpu.dimension_semantics<arbitrary>, #tpu.dimension_semantics<arbitrary>], iteration_bounds = array<i64: 2, 3>, scalar_prefetch = 0 : i64, scratch_operands = 3 : i64, tpu.core_type = #tpu.core_type<tc>, window_params = [{transform_indices = @transform_0, window_bounds = array<i64: 256, 8>}, {pipeline_mode = #tpu.pipeline_mode<synchronous>, transform_indices = @transform_1, window_bounds = array<i64: 10, 8>}, {pipeline_mode = #tpu.pipeline_mode<synchronous>, transform_indices = @transform_2, window_bounds = array<i64: 10, 3>}, {pipeline_mode = #tpu.pipeline_mode<synchronous>, transform_indices = @transform_3, window_bounds = array<i64: 1, 2>}, {transform_indices = @transform_4, window_bounds = array<i64: 1, 256>}, {pipeline_mode = #tpu.pipeline_mode<synchronous>, transform_indices = @transform_5, window_bounds = array<i64: 1, 2>}]} {
    %c0_i32 = arith.constant 0 : i32
    %0 = arith.cmpi eq, %arg0, %c0_i32 : i32
    %c0_i32_0 = arith.constant 0 : i32
    %1 = arith.cmpi eq, %arg1, %c0_i32_0 : i32
    %2 = arith.andi %0, %1 : i1
    %3 = arith.extui %2 : i1 to i32
    %c0_i32_1 = arith.constant 0 : i32
    %4 = arith.cmpi ne, %3, %c0_i32_1 : i32
    scf.if %4 {
      %cst_13 = arith.constant 0.000000e+00 : f32
      %30 = vector.broadcast %cst_13 : f32 to vector<10x2xf32>
      %c0_14 = arith.constant 0 : index
      %c0_15 = arith.constant 0 : index
      %31 = vector.load %arg8[%c0_14, %c0_15] : memref<10x2xf32, #tpu.memory_space<vmem>>, vector<10x2xf32>
      tpu.vector_store %arg8[%c0_14, %c0_15], %30 {strides = array<i32>} : memref<10x2xf32, #tpu.memory_space<vmem>>, vector<10x2xf32>,
      %cst_16 = arith.constant 0.000000e+00 : f32
      %32 = vector.broadcast %cst_16 : f32 to vector<1x2xf32>
      %c0_17 = arith.constant 0 : index
      %c0_18 = arith.constant 0 : index
      %33 = vector.load %arg9[%c0_17, %c0_18] : memref<1x2xf32, #tpu.memory_space<vmem>>, vector<1x2xf32>
      tpu.vector_store %arg9[%c0_17, %c0_18], %32 {strides = array<i32>} : memref<1x2xf32, #tpu.memory_space<vmem>>, vector<1x2xf32>,
    } else {
    }
    %c0 = arith.constant 0 : index
    %c0_2 = arith.constant 0 : index
    %5 = vector.load %arg3[%c0, %c0_2] : memref<10x8xf32, #tpu.memory_space<vmem>>, vector<10x8xf32>
    %c0_3 = arith.constant 0 : index
    %c0_4 = arith.constant 0 : index
    %6 = vector.load %arg2[%c0_3, %c0_4] : memref<256x8xf32, #tpu.memory_space<vmem>>, vector<256x8xf32>
    %cst = arith.constant dense<0.000000e+00> : vector<10x256xf32>
    %7 = tpu.matmul %5, %6, %cst {dimension_numbers = #tpu.dot_dimension_numbers<[1], [1], [0], [0], [0, 0, 1, 0], [], []>} : vector<10x8xf32>, vector<256x8xf32>, vector<10x256xf32> -> vector<10x256xf32>
    %8 = tpu.iota {dimensions = array<i32: 1>} : vector<1x256xi32>
    %c256_i32 = arith.constant 256 : i32
    %9 = arith.muli %arg1, %c256_i32 : i32
    %10 = vector.broadcast %9 : i32 to vector<1x256xi32>
    %11 = arith.addi %8, %10 : vector<1x256xi32>
    %c700_i32 = arith.constant 700 : i32
    %12 = vector.broadcast %c700_i32 : i32 to vector<1x256xi32>
    %13 = arith.cmpi slt, %11, %12 : vector<1x256xi32>
    %c0_i32_5 = arith.constant 0 : i32
    %14 = arith.cmpi eq, %arg0, %c0_i32_5 : i32
    %15 = arith.extui %14 : i1 to i32
    %c0_i32_6 = arith.constant 0 : i32
    %16 = arith.cmpi ne, %15, %c0_i32_6 : i32
    scf.if %16 {
      %cst_13 = arith.constant 0.000000e+00 : f32
      %30 = vector.shape_cast %13 : vector<1x256xi1> to vector<1x256xi1>
      %31 = vector.broadcast %30 : vector<1x256xi1> to vector<10x256xi1>
      %32 = vector.broadcast %cst_13 : f32 to vector<10x256xf32>
      %33 = arith.select %31, %7, %32 : vector<10x256xi1>, vector<10x256xf32>
      %c0_14 = arith.constant 0 : index
      %c0_15 = arith.constant 0 : index
      %34 = vector.load %arg8[%c0_14, %c0_15] : memref<10x2xf32, #tpu.memory_space<vmem>>, vector<10x1xf32>
      %cst_16 = arith.constant dense<0.000000e+00> : vector<10xf32>
      %35 = vector.multi_reduction <add>, %33, %cst_16 [1] : vector<10x256xf32> to vector<10xf32>
      %36 = vector.shape_cast %35 : vector<10xf32> to vector<10x1xf32>
      %37 = arith.addf %34, %36 : vector<10x1xf32>
      %c0_17 = arith.constant 0 : index
      %c0_18 = arith.constant 0 : index
      %38 = vector.load %arg8[%c0_17, %c0_18] : memref<10x2xf32, #tpu.memory_space<vmem>>, vector<10x1xf32>
      tpu.vector_store %arg8[%c0_17, %c0_18], %37 {strides = array<i32>} : memref<10x2xf32, #tpu.memory_space<vmem>>, vector<10x1xf32>,
      %c0_19 = arith.constant 0 : index
      %c1 = arith.constant 1 : index
      %39 = vector.load %arg8[%c0_19, %c1] : memref<10x2xf32, #tpu.memory_space<vmem>>, vector<10x1xf32>
      %40 = arith.mulf %33, %33 : vector<10x256xf32>
      %cst_20 = arith.constant dense<0.000000e+00> : vector<10xf32>
      %41 = vector.multi_reduction <add>, %40, %cst_20 [1] : vector<10x256xf32> to vector<10xf32>
      %42 = vector.shape_cast %41 : vector<10xf32> to vector<10x1xf32>
      %43 = arith.addf %39, %42 : vector<10x1xf32>
      %c0_21 = arith.constant 0 : index
      %c1_22 = arith.constant 1 : index
      %44 = vector.load %arg8[%c0_21, %c1_22] : memref<10x2xf32, #tpu.memory_space<vmem>>, vector<10x1xf32>
      tpu.vector_store %arg8[%c0_21, %c1_22], %43 {strides = array<i32>} : memref<10x2xf32, #tpu.memory_space<vmem>>, vector<10x1xf32>,
    } else {
    }
    %c1_i32 = arith.constant 1 : i32
    %17 = arith.cmpi eq, %arg0, %c1_i32 : i32
    %c0_i32_7 = arith.constant 0 : i32
    %18 = arith.cmpi eq, %arg1, %c0_i32_7 : i32
    %19 = arith.andi %17, %18 : i1
    %20 = arith.extui %19 : i1 to i32
    %c0_i32_8 = arith.constant 0 : i32
    %21 = arith.cmpi ne, %20, %c0_i32_8 : i32
    scf.if %21 {
      %c0_13 = arith.constant 0 : index
      %c0_14 = arith.constant 0 : index
      %30 = vector.load %arg8[%c0_13, %c0_14] : memref<10x2xf32, #tpu.memory_space<vmem>>, vector<10x1xf32>
      %cst_15 = arith.constant 0.00142857141 : f32
      %31 = vector.broadcast %cst_15 : f32 to vector<10x1xf32>
      %32 = arith.mulf %30, %31 : vector<10x1xf32>
      %c0_16 = arith.constant 0 : index
      %c1 = arith.constant 1 : index
      %33 = vector.load %arg8[%c0_16, %c1] : memref<10x2xf32, #tpu.memory_space<vmem>>, vector<10x1xf32>
      %cst_17 = arith.constant 0.00142857141 : f32
      %34 = vector.broadcast %cst_17 : f32 to vector<10x1xf32>
      %35 = arith.mulf %33, %34 : vector<10x1xf32>
      %36 = arith.mulf %32, %32 : vector<10x1xf32>
      %37 = arith.subf %35, %36 : vector<10x1xf32>
      %cst_18 = arith.constant 0.000000e+00 : f32
      %38 = vector.broadcast %cst_18 : f32 to vector<10x1xf32>
      %39 = arith.maximumf %37, %38 : vector<10x1xf32>
      %c0_19 = arith.constant 0 : index
      %c0_20 = arith.constant 0 : index
      %40 = vector.load %arg4[%c0_19, %c0_20] : memref<10x3xf32, #tpu.memory_space<vmem>>, vector<10x1xf32>
      %cst_21 = arith.constant 9.99999974E-6 : f32
      %41 = vector.broadcast %cst_21 : f32 to vector<10x1xf32>
      %42 = arith.addf %39, %41 : vector<10x1xf32>
      %43 = math.rsqrt %42 : vector<10x1xf32>
      %44 = arith.mulf %40, %43 : vector<10x1xf32>
      %c0_22 = arith.constant 0 : index
      %c0_23 = arith.constant 0 : index
      %45 = vector.load %arg10[%c0_22, %c0_23] : memref<10x2xf32, #tpu.memory_space<vmem>>, vector<10x1xf32>
      tpu.vector_store %arg10[%c0_22, %c0_23], %44 {strides = array<i32>} : memref<10x2xf32, #tpu.memory_space<vmem>>, vector<10x1xf32>,
      %c0_24 = arith.constant 0 : index
      %c1_25 = arith.constant 1 : index
      %46 = vector.load %arg4[%c0_24, %c1_25] : memref<10x3xf32, #tpu.memory_space<vmem>>, vector<10x1xf32>
      %47 = arith.mulf %32, %44 : vector<10x1xf32>
      %48 = arith.subf %46, %47 : vector<10x1xf32>
      %c0_26 = arith.constant 0 : index
      %c1_27 = arith.constant 1 : index
      %49 = vector.load %arg10[%c0_26, %c1_27] : memref<10x2xf32, #tpu.memory_space<vmem>>, vector<10x1xf32>
      tpu.vector_store %arg10[%c0_26, %c1_27], %48 {strides = array<i32>} : memref<10x2xf32, #tpu.memory_space<vmem>>, vector<10x1xf32>,
    } else {
    }
    %c1_i32_9 = arith.constant 1 : i32
    %22 = arith.cmpi eq, %arg0, %c1_i32_9 : i32
    %23 = arith.extui %22 : i1 to i32
    %c0_i32_10 = arith.constant 0 : i32
    %24 = arith.cmpi ne, %23, %c0_i32_10 : i32
    scf.if %24 {
      %c0_13 = arith.constant 0 : index
      %c0_14 = arith.constant 0 : index
      %30 = vector.load %arg10[%c0_13, %c0_14] : memref<10x2xf32, #tpu.memory_space<vmem>>, vector<10x1xf32>
      %31 = vector.broadcast %30 : vector<10x1xf32> to vector<10x256xf32>
      %32 = arith.mulf %7, %31 : vector<10x256xf32>
      %c0_15 = arith.constant 0 : index
      %c1 = arith.constant 1 : index
      %33 = vector.load %arg10[%c0_15, %c1] : memref<10x2xf32, #tpu.memory_space<vmem>>, vector<10x1xf32>
      %34 = vector.broadcast %33 : vector<10x1xf32> to vector<10x256xf32>
      %35 = arith.addf %32, %34 : vector<10x256xf32>
      %cst_16 = arith.constant 0.000000e+00 : f32
      %36 = vector.broadcast %cst_16 : f32 to vector<10x256xf32>
      %37 = arith.maximumf %35, %36 : vector<10x256xf32>
      %c0_17 = arith.constant 0 : index
      %c2 = arith.constant 2 : index
      %38 = vector.load %arg4[%c0_17, %c2] : memref<10x3xf32, #tpu.memory_space<vmem>>, vector<10x1xf32>
      %39 = vector.broadcast %38 : vector<10x1xf32> to vector<10x256xf32>
      %40 = arith.mulf %37, %39 : vector<10x256xf32>
      %cst_18 = arith.constant dense<0.000000e+00> : vector<256xf32>
      %41 = vector.multi_reduction <add>, %40, %cst_18 [0] : vector<10x256xf32> to vector<256xf32>
      %42 = vector.shape_cast %41 : vector<256xf32> to vector<1x256xf32>
      %c0_19 = arith.constant 0 : index
      %c0_20 = arith.constant 0 : index
      %43 = vector.load %arg6[%c0_19, %c0_20] : memref<1x256xf32, #tpu.memory_space<vmem>>, vector<1x256xf32>
      tpu.vector_store %arg6[%c0_19, %c0_20], %42 {strides = array<i32>} : memref<1x256xf32, #tpu.memory_space<vmem>>, vector<1x256xf32>,
      %cst_21 = arith.constant 0.000000e+00 : f32
      %44 = vector.broadcast %cst_21 : f32 to vector<1x256xf32>
      %45 = arith.select %13, %42, %44 : vector<1x256xi1>, vector<1x256xf32>
      %c0_22 = arith.constant 0 : index
      %c0_23 = arith.constant 0 : index
      %46 = vector.load %arg9[%c0_22, %c0_23] : memref<1x2xf32, #tpu.memory_space<vmem>>, vector<1x1xf32>
      %cst_24 = arith.constant dense<0.000000e+00> : vector<1xf32>
      %47 = vector.multi_reduction <add>, %45, %cst_24 [1] : vector<1x256xf32> to vector<1xf32>
      %48 = vector.shape_cast %47 : vector<1xf32> to vector<1x1xf32>
      %49 = arith.addf %46, %48 : vector<1x1xf32>
      %c0_25 = arith.constant 0 : index
      %c0_26 = arith.constant 0 : index
      %50 = vector.load %arg9[%c0_25, %c0_26] : memref<1x2xf32, #tpu.memory_space<vmem>>, vector<1x1xf32>
      tpu.vector_store %arg9[%c0_25, %c0_26], %49 {strides = array<i32>} : memref<1x2xf32, #tpu.memory_space<vmem>>, vector<1x1xf32>,
      %c0_27 = arith.constant 0 : index
      %c1_28 = arith.constant 1 : index
      %51 = vector.load %arg9[%c0_27, %c1_28] : memref<1x2xf32, #tpu.memory_space<vmem>>, vector<1x1xf32>
      %52 = arith.mulf %45, %45 : vector<1x256xf32>
      %cst_29 = arith.constant dense<0.000000e+00> : vector<1xf32>
      %53 = vector.multi_reduction <add>, %52, %cst_29 [1] : vector<1x256xf32> to vector<1xf32>
      %54 = vector.shape_cast %53 : vector<1xf32> to vector<1x1xf32>
      %55 = arith.addf %51, %54 : vector<1x1xf32>
      %c0_30 = arith.constant 0 : index
      %c1_31 = arith.constant 1 : index
      %56 = vector.load %arg9[%c0_30, %c1_31] : memref<1x2xf32, #tpu.memory_space<vmem>>, vector<1x1xf32>
      tpu.vector_store %arg9[%c0_30, %c1_31], %55 {strides = array<i32>} : memref<1x2xf32, #tpu.memory_space<vmem>>, vector<1x1xf32>,
    } else {
    }
    %c1_i32_11 = arith.constant 1 : i32
    %25 = arith.cmpi eq, %arg0, %c1_i32_11 : i32
    %c2_i32 = arith.constant 2 : i32
    %26 = arith.cmpi eq, %arg1, %c2_i32 : i32
    %27 = arith.andi %25, %26 : i1
    %28 = arith.extui %27 : i1 to i32
    %c0_i32_12 = arith.constant 0 : i32
    %29 = arith.cmpi ne, %28, %c0_i32_12 : i32
    scf.if %29 {
      %c0_13 = arith.constant 0 : index
      %c0_14 = arith.constant 0 : index
      %30 = vector.load %arg9[%c0_13, %c0_14] : memref<1x2xf32, #tpu.memory_space<vmem>>, vector<1x1xf32>
      %cst_15 = arith.constant 0.00142857141 : f32
      %31 = vector.broadcast %cst_15 : f32 to vector<1x1xf32>
      %32 = arith.mulf %30, %31 : vector<1x1xf32>
      %c0_16 = arith.constant 0 : index
      %c1 = arith.constant 1 : index
      %33 = vector.load %arg9[%c0_16, %c1] : memref<1x2xf32, #tpu.memory_space<vmem>>, vector<1x1xf32>
      %cst_17 = arith.constant 0.00142857141 : f32
      %34 = vector.broadcast %cst_17 : f32 to vector<1x1xf32>
      %35 = arith.mulf %33, %34 : vector<1x1xf32>
      %36 = arith.mulf %32, %32 : vector<1x1xf32>
      %37 = arith.subf %35, %36 : vector<1x1xf32>
      %cst_18 = arith.constant 0.000000e+00 : f32
      %38 = vector.broadcast %cst_18 : f32 to vector<1x1xf32>
      %39 = arith.maximumf %37, %38 : vector<1x1xf32>
      %c0_19 = arith.constant 0 : index
      %c0_20 = arith.constant 0 : index
      %40 = vector.load %arg5[%c0_19, %c0_20] : memref<1x2xf32, #tpu.memory_space<vmem>>, vector<1x1xf32>
      %cst_21 = arith.constant 9.99999974E-6 : f32
      %41 = vector.broadcast %cst_21 : f32 to vector<1x1xf32>
      %42 = arith.addf %39, %41 : vector<1x1xf32>
      %43 = math.rsqrt %42 : vector<1x1xf32>
      %44 = arith.mulf %40, %43 : vector<1x1xf32>
      %c0_22 = arith.constant 0 : index
      %c0_23 = arith.constant 0 : index
      %45 = vector.load %arg7[%c0_22, %c0_23] : memref<1x2xf32, #tpu.memory_space<vmem>>, vector<1x1xf32>
      tpu.vector_store %arg7[%c0_22, %c0_23], %44 {strides = array<i32>} : memref<1x2xf32, #tpu.memory_space<vmem>>, vector<1x1xf32>,
      %c0_24 = arith.constant 0 : index
      %c1_25 = arith.constant 1 : index
      %46 = vector.load %arg5[%c0_24, %c1_25] : memref<1x2xf32, #tpu.memory_space<vmem>>, vector<1x1xf32>
      %47 = arith.mulf %32, %44 : vector<1x1xf32>
      %48 = arith.subf %46, %47 : vector<1x1xf32>
      %c0_26 = arith.constant 0 : index
      %c1_27 = arith.constant 1 : index
      %49 = vector.load %arg7[%c0_26, %c1_27] : memref<1x2xf32, #tpu.memory_space<vmem>>, vector<1x1xf32>
      tpu.vector_store %arg7[%c0_26, %c1_27], %48 {strides = array<i32>} : memref<1x2xf32, #tpu.memory_space<vmem>>, vector<1x1xf32>,
    } else {
    }
    return
  }
  func.func @transform_0(%arg0: i32, %arg1: i32) -> (i32, i32) {
    %c0_i32 = arith.constant 0 : i32
    %c0_i32_0 = arith.constant 0 : i32
    return %arg1, %c0_i32 : i32, i32
  }
  func.func @transform_1(%arg0: i32, %arg1: i32) -> (i32, i32) {
    %c0_i32 = arith.constant 0 : i32
    %c0_i32_0 = arith.constant 0 : i32
    %c0_i32_1 = arith.constant 0 : i32
    return %c0_i32, %c0_i32_0 : i32, i32
  }
  func.func @transform_2(%arg0: i32, %arg1: i32) -> (i32, i32) {
    %c0_i32 = arith.constant 0 : i32
    %c0_i32_0 = arith.constant 0 : i32
    %c0_i32_1 = arith.constant 0 : i32
    return %c0_i32, %c0_i32_0 : i32, i32
  }
  func.func @transform_3(%arg0: i32, %arg1: i32) -> (i32, i32) {
    %c0_i32 = arith.constant 0 : i32
    %c0_i32_0 = arith.constant 0 : i32
    %c0_i32_1 = arith.constant 0 : i32
    return %c0_i32, %c0_i32_0 : i32, i32
  }
  func.func @transform_4(%arg0: i32, %arg1: i32) -> (i32, i32) {
    %0 = arith.muli %arg0, %arg1 : i32
    %c0_i32 = arith.constant 0 : i32
    %c0_i32_0 = arith.constant 0 : i32
    return %c0_i32, %0 : i32, i32
  }
  func.func @transform_5(%arg0: i32, %arg1: i32) -> (i32, i32) {
    %c0_i32 = arith.constant 0 : i32
    %c0_i32_0 = arith.constant 0 : i32
    %c0_i32_1 = arith.constant 0 : i32
    return %c0_i32, %c0_i32_0 : i32, i32
  }
}

</mosaic_0001>

<bundles_post_ra>
// kernel: net_forward.3
= control target key start
LH: loop header
LB: loop body
LE: loop exit
PB: predicated region body
PF: predicated region fallthrough
CT: control target
= control target key end

     0   :  { %7 = vsyncpa [#allocation3], 0  ;;  %s480_s0 = inlined_call_operand.vmem [shape: f32[1,2], index: 0, kind: input, shape index: {}]   ;;  %s481_s1 = inlined_call_operand.vmem [shape: f32[1,700], index: 1, kind: input, shape index: {}]   ;;  %s482_s2 = inlined_call_operand.hbm [shape: f32[1,700], index: 2, kind: output, shape index: {}]  }
   0x1   :  { %9 = vsyncpa [#allocation3 + $0x1], 0  ;;  %s385_s9 = smov 0   ;;  %s387_s10 = smov 0  }
   0x2   :  { %s389_s11 = smov 0   ;;  %s391_s12 = smov 0  }
   0x3 LB: > { %s406_s13 = sadd.s32 4294967295, %s365_s12   ;;  %s245_s14 = sadd.s32 4294967294, %s365_s12   ;;  %s365_s12 = sphi %s391_s12, %s488_s12   ;;  %s361_s11 = sphi %s389_s11, %s487_s11   ;;  %s357_s10 = sphi %s387_s10, %s486_s10   ;;  %s353_s9 = sphi %s385_s9, %s485_s9  }
   0x4   : > { %s410_s15 = sadd.s32 1, %s365_s12   ;;  %s69_s16 = sadd.s32 1, %s361_s11 }
   0x5   : > { %s66_s17 = ssub.s32 %s365_s12, %s410_s15  ;;  %p79_p0 = scmp.ne.s32.totalorder %s361_s11, %s357_s10 }
   0x6   : > { %p67_p1 = scmp.eq.s32.totalorder %s66_s17, 0  ;;  %p80_p2 = scmp.eq.s32.totalorder %s406_s13, 2 }
   0x7   : > { %p85_p3 = scmp.ne.s32.totalorder %s357_s10, %s353_s9  ;;  %p86_p4 = scmp.eq.s32.totalorder %s245_s14, 2 }
   0x8   : > { %s421_s18 = scalar_select %p67_p1, %s361_s11, %s69_s16  }
   0x9   : > { %p423_p5 = por %p80_p2, %p79_p0  ;;  %p427_p6 = por %p86_p4, %p85_p3 }
   0xa   : > { %p248_p7 = scmp.ge.s32.totalorder %s365_s12, 1  ;;  %p115_p8 = scmp.lt.s32.totalorder %s365_s12, 4 }
   0xc   : > { %p116_p9 = pnand %p248_p7, %p115_p8 }
   0xd   : > { %s250_s23 = sshll.u32 (!%p116_p9), %s406_s13, 1  ;;  %s133_s27 = sand.u32 (!%p116_p9), 1, %s357_s10  }
   0xe   : > { %119 = sbr.rel (%p116_p9) target bundleno = 199 (0xc7), region = 28  ;;  %p137_p10 = scmp.lt.s32.totalorder (!%p116_p9), %s250_s23, 5 }
   0xf   : > { %s249_s28 = sshll.u32 (!%p116_p9), %s133_s27, 1  ;;  %s257_s29 = sshll.u32 (!%p116_p9), %s406_s13, 5 }
  0x10   : > { %s135_s30 = scalar_lea.vmem (!%p116_p9), [#allocation2], %s249_s28  ;;  %s445_s6 = scalar_lea.hbm (!%p116_p9), %s482_s2, %s257_s29 }
  0x11   : > { %s189_s3 = sshll.u32 (!%p116_p9), %s135_s30, 4  ;;  %s175_s7 = scalar_lea.sflag (!%p116_p9), [#allocation3], %s133_s27  ;;  %s190_s3 = int_to_ptr.vmem [resolvable:$true] %s189_s3 }
  0x12   : > { %s305_s8 = scalar_lea.vmem (!%p116_p9), %s190_s3, 32  ;;  %s369_s14 = smov (!%p116_p9), [#allocation2]  }
  0x13   : > { %v143_v0 = vld [vmem:[%s480_s0] sm:$0x1]  ;;  %v367_v1 = vmov 0   ;;  %v368_v2 = vmov 1   ;;  %v149_v3 = vlaneseq  ;;  %s490_s23 = smov (!%p137_p10, %s250_s23), 5  ;;  %p306_p11 = scmp.ne.s32.totalorder %s190_s3, %s305_s8 }
  0x14   : > { %299 = vset.pattern.permute.xlu0 %v367_v1  ;;  %s139_s26 = scalar_lea.vmem %s481_s1, %s490_s23  ;;  %s309_s16 = sshll.u32 %s369_s14, 4  ;;  %s310_s16 = int_to_ptr.vmem [resolvable:$false] %s309_s16 }
  0x15   : > { %146 = vperm.xlu0 %299, %v143_v0   ;;  %v150_v4 = vshrl.u32 %v149_v3, 7  ;;  %v142_v8 = vld [vmem:[%s139_s26] sm:$0x3]  ;;  %vm171_vm0 = vcmp.lt.s32.totalorder %v149_v3, 256  ;;  %p307_p12 = pnand %p306_p11, %p423_p5  ;;  %s311_s13 = scalar_lea.vmem %s310_s16, 64 }
  0x16   : > { %p312_p0 = scmp.lt.s32.totalorder %s190_s3, %s310_s16  ;;  %p313_p1 = scmp.lt.s32.totalorder %s311_s13, %s305_s8 }
  0x17   : > { %v151_v5 = vsub.s32 0, %v150_v4  ;;  %p308_p13 = pneg %p307_p12 }
  0x18   : > { %p314_p2 = por %p313_p1, %p312_p0 }
  0x19   : > { %300 = vset.pattern.permute.xlu0 %v368_v2 }
  0x1a   : > { %155 = vperm.xlu0 %300, %v143_v0   ;;  %p315_p3 = pnand %p314_p2, %p308_p13 }
  0x90   : > { %v147_v6 = vpop.permute.xlu0 %146 }
  0x91   : > { %v152_v7 = vrot.slane %v147_v6, %v151_v5 }
  0x93   : > { %v153_v10 = vmul.f32 %v152_v7, %v142_v8 }
  0x95   : > { %v156_v9 = vpop.permute.xlu0 %155 }
  0x96   : > { %v161_v11 = vrot.slane %v156_v9, %v151_v5 }
  0x98   : > { %v162_v12 = vadd.f32 %v161_v11, %v153_v10 }
  0x9a   : > { %v251_v13 = vmul.f32 -1.442695, %v162_v12 }
  0x9c   : > { %301 = vpow2.f32 %v251_v13 }
  0xa9   : > { %v302_v14 = vpop.eup %301 }
  0xaa   : > { %v166_v15 = vadd.f32 1.0, %v302_v14 }
  0xac   : > { %303 = vrcp.f32 %v166_v15 }
  0xb9   : > { %v304_v16 = vpop.eup %303 }
  0xba   : > { %173 = vst.msk [vmem:[%s135_s30] sm:$0x3] %vm171_vm0, %v304_v16 }
  0xbb   : > { %318 = shalt.err (!%p315_p3)
}
  0xbc   : > { %s319_s17 = scalar_lea.hbm %s445_s6, 32  ;;  %s323_s23 = scalar_lea.hbm %s482_s2, 96 }
  0xbd   : > { %p320_p4 = scmp.ne.s32.totalorder %s445_s6, %s319_s17  ;;  %p324_p9 = scmp.lt.s32.totalorder %s445_s6, %s482_s2 }
  0xbe   : > { %p325_p10 = scmp.lt.s32.totalorder %s323_s23, %s319_s17 }
  0xbf   : > { %p321_p7 = pnand %p320_p4, %p423_p5 }
  0xc0   : > { %p326_p11 = por %p325_p10, %p324_p9 }
  0xc1   : > { %p322_p8 = pneg %p321_p7 }
  0xc3   : > { %p327_p12 = pnand %p326_p11, %p322_p8 }
  0xc5   : > { %330 = shalt.err (!%p327_p12)
}
  0xc6   : > { %258 = dma.vmem_to_hbm [thread:$0]  (%p423_p5), %s190_s3, 32, %s445_s6, %s175_s7  }
  0xc7 PF: > { %p264_p13 = scmp.ge.s32.totalorder %s365_s12, 2  ;;  %s201_s26 = sand.u32 1, %s353_s9  }
  0xc8   : > { %s202_s27 = scalar_lea.sflag [#allocation3], %s201_s26 }
  0xc9   : > { %p261_p0 = pnand %p264_p13, %p427_p6 }
  0xcb   : > { %p262_p1 = pneg %p261_p0 }
  0xcd   : > { %348 = dma.done.wait (%p262_p1), %s202_s27, 32  }
  0xce   : > { %350 = vsyncadd (%p262_p1), %s202_s27, 4294967264  ;;  %p12_p2 = scmp.ge.s32.totalorder %s410_s15, 5   ;;  %s485_s9 = smov %s357_s10 }
  0xcf   : > { %s486_s10 = smov %s361_s11  ;;  %s487_s11 = smov %s421_s18 }
  0xd0   : > { %s488_s12 = smov %s410_s15  ;;  %14 = sbr.rel (!%p12_p2) target bundleno = 3 (0x3), region = 63 }
  0xd5   :  { %207 = vsyncpa [#allocation3], 1 }
  0xd6   :  { %209 = vsyncpa [#allocation3 + $0x1], 1 }

// kernel: net_forward.2
= control target key start
LH: loop header
LB: loop body
LE: loop exit
PB: predicated region body
PF: predicated region fallthrough
CT: control target
= control target key end

     0   :  { %s1071_s18 = smov 0   ;;  %s1073_s19 = smov 0   ;;  %s1336_s0 = inlined_call_operand.vmem [shape: f32[700,8], index: 0, kind: input, shape index: {}]   ;;  %s1337_s1 = inlined_call_operand.vmem [shape: f32[10,8], index: 1, kind: input, shape index: {}]   ;;  %s1338_s2 = inlined_call_operand.vmem [shape: f32[10,3], index: 2, kind: input, shape index: {}]   ;;  %s1339_s3 = inlined_call_operand.vmem [shape: f32[1,2], index: 3, kind: input, shape index: {}]   ;;  %s1340_s4 = inlined_call_operand.vmem [shape: f32[1,700], index: 4, kind: output, shape index: {0}]   ;;  %s1341_s5 = inlined_call_operand.vmem [shape: f32[1,2], index: 5, kind: output, shape index: {1}]  }
   0x1   :  { %s1075_s20 = smov 0   ;;  %s1077_s21 = smov 0  }
   0x2   :  { %s1079_s22 = smov 0  }
   0x3 LB: > { %s25_s23 = sadd.s32 1, %s1022_s20  ;;  %s28_s24 = sadd.s32 1, %s1026_s21  ;;  %s1030_s22 = sphi %s1079_s22, %s16_s22   ;;  %s1026_s21 = sphi %s1077_s21, %s1345_s21   ;;  %s1022_s20 = sphi %s1075_s20, %s1344_s20   ;;  %s1018_s19 = sphi %s1073_s19, %s1343_s19   ;;  %s1014_s18 = sphi %s1071_s18, %s1342_s18  }
   0x4   : > { %p26_p0 = scmp.ge.s32.totalorder %s25_s23, 3  ;;  %p822_p1 = scmp.ge.s32.totalorder %s1030_s22, 1 }
   0x5   : > { %p208_p2 = scmp.lt.s32.totalorder %s1030_s22, 7 }
   0x6   : > { %s1347_s23 = smov (%p26_p0, %s25_s23), 0  ;;  %s1349_s24 = smov (!%p26_p0, %s28_s24), %s1026_s21 }
   0x7   : > { %p209_p3 = pnand %p822_p1, %p208_p2  ;;  %p30_p4 = scmp.ge.s32.totalorder %s1349_s24, 2 }
   0x8   : > { %s823_s25 = sshll.u32 (!%p209_p3), %s1014_s18, 5  ;;  %s254_s26 = smul.u32 (!%p209_p3), %s1014_s18, %s1018_s19 }
   0x9   : > { %s1351_s24 = smov (%p30_p4, %s1349_s24), 0  ;;  %212 = sbr.rel (%p209_p3) target bundleno = 1532 (0x5fc), region = 36 }
   0xa   : > { %p245_p5 = scmp.lt.s32.totalorder (!%p209_p3), %s823_s25, 87  ;;  %p261_p6 = scmp.eq.s32.totalorder (!%p209_p3), %s1018_s19, 0 }
   0xb   : > { %s825_s27 = sshll.u32 (!%p209_p3), %s254_s26, 1  ;;  %p262_p7 = scmp.eq.s32.totalorder (!%p209_p3), %s1014_s18, 0 }
   0xc   : > { %p256_p8 = scmp.lt.s32.totalorder (!%p209_p3), %s825_s27, 5 }
   0xd   : > { %p263_p9 = pnand (!%p209_p3), %p262_p7, %p261_p6 }
   0xe   : > { %s1353_s25 = smov (!%p245_p5, %s823_s25), 87  ;;  %s1355_s27 = smov (!%p256_p8, %s825_s27), 5 }
   0xf   : > { %s824_s28 = sshll.u32 %s1353_s25, 3  ;;  %s258_s9 = scalar_lea.vmem %s1340_s4, %s1355_s27 }
  0x10   : > { %s1115_s6 = scalar_lea.vmem %s1336_s0, %s824_s28  ;;  %266 = sbr.rel (%p263_p9) target bundleno = 25 (0x19), region = 40 }
  0x15   : > { %vm267_vm0 = vcmask 15360   ;;  %vm269_vm1 = vcmask 9216   ;;  %vm271_vm2 = vcmask 8192   ;;  %v1032_v0 = vmov 0.0  }
  0x16   : > { %268 = vst.msk [vmem:[#allocation2] sm:$0xff] %vm267_vm0, %v1032_v0 }
  0x17   : > { %270 = vst.msk [vmem:[#allocation2 + $0x8] sm:$0x3] %vm269_vm1, %v1032_v0 }
  0x18   : > { %272 = vst.msk [vmem:[#allocation3] sm:$0x1] %vm271_vm2, %v1032_v0 }
  0x19 PF: > { %v306_v1 = vld [vmem:[%s1115_s6 + $0xf8] sm:$0xff]  ;;  %vm307_vm3 = vcmask 64512   ;;  %v305_v3 = vld [vmem:[%s1115_s6 + $0xf0] sm:$0xff]  ;;  %v304_v5 = vld [vmem:[%s1115_s6 + $0xe8] sm:$0xff]  ;;  %v487_v35 = vlaneseq  ;;  %s860_s14 = sshll.u32 %s1014_s18, 8  ;;  %p861_p10 = scmp.ne.s32.totalorder %s1018_s19, 0 }
  0x1a   : > { %v290_v2 = vld [vmem:[%s1115_s6 + $0x78] sm:$0xff]  ;;  %865 = vmatprep.subr.msk.mxu0 %vm307_vm3, %v306_v1  ;;  %901 = vmatprep.subr.msk.mxu1 %vm307_vm3, %v306_v1  ;;  %v289_v4 = vld [vmem:[%s1115_s6 + $0x70] sm:$0xff]  ;;  %v288_v6 = vld [vmem:[%s1115_s6 + $0x68] sm:$0xff]  ;;  %v491_v38 = vstv %s860_s14 }
  0x1b   : > { %866 = vmatpush3.xpose.msk.msra.mxu0 %vm307_vm3, %v290_v2  ;;  %917 = vmatpush3.xpose.msk.msra.mxu1 %vm307_vm3, %v290_v2  ;;  %v303_v7 = vld [vmem:[%s1115_s6 + $0xe0] sm:$0xff]  ;;  %v1153_v10 = vld [vmem:[%s1337_s1 + $0x8] sm:$0x3]  ;;  %v302_v11 = vld [vmem:[%s1115_s6 + $0xd8] sm:$0xff]  ;;  %v488_v36 = vand.u32 127, %v487_v35 }
  0x1c   : > { %867 = vmatprep.subr.msk.mxu0 %vm307_vm3, %v305_v3  ;;  %902 = vmatprep.subr.msk.mxu1 %vm307_vm3, %v305_v3  ;;  %v1145_v8 = vld [vmem:[%s1337_s1] sm:$0xff]  ;;  %v286_v12 = vld [vmem:[%s1115_s6 + $0x58] sm:$0xff]  ;;  %v301_v13 = vld [vmem:[%s1115_s6 + $0xd0] sm:$0xff] }
  0x1d   : > { %v287_v9 = vld [vmem:[%s1115_s6 + $0x60] sm:$0xff]  ;;  %897 = vmatprep.mubr.msk.f32.mxu0 %vm307_vm3, %v1145_v8  ;;  %899 = vmatprep.mubr.msk.f32.mxu1 %vm307_vm3, %v1153_v10  ;;  %v285_v14 = vld [vmem:[%s1115_s6 + $0x50] sm:$0xff]  ;;  %v300_v15 = vld [vmem:[%s1115_s6 + $0xc8] sm:$0xff]  ;;  %v489_v37 = vadd.s32 128, %v488_v36  ;;  %v1239_v39 = vadd.s32 %v491_v38, %v488_v36 }
  0x1e   : > { %v284_v16 = vld [vmem:[%s1115_s6 + $0x48] sm:$0xff]  ;;  %v299_v17 = vld [vmem:[%s1115_s6 + $0xc0] sm:$0xff]  ;;  %v298_v19 = vld [vmem:[%s1115_s6 + $0xb8] sm:$0xff] }
  0x1f   : > { %868 = vmatpush3.xpose.msk.msra.mxu0 %vm307_vm3, %v289_v4  ;;  %918 = vmatpush3.xpose.msk.msra.mxu1 %vm307_vm3, %v289_v4  ;;  %v283_v18 = vld [vmem:[%s1115_s6 + $0x40] sm:$0xff]  ;;  %v282_v20 = vld [vmem:[%s1115_s6 + $0x38] sm:$0xff]  ;;  %v297_v21 = vld [vmem:[%s1115_s6 + $0xb0] sm:$0xff]  ;;  %v1241_v40 = vadd.s32 %v491_v38, %v489_v37  ;;  %vm494_vm4 = vcmp.lt.s32.totalorder %v1239_v39, 700 }
  0x20   : > { %869 = vmatprep.subr.msk.mxu0 %vm307_vm3, %v304_v5  ;;  %903 = vmatprep.subr.msk.mxu1 %vm307_vm3, %v304_v5  ;;  %v281_v22 = vld [vmem:[%s1115_s6 + $0x30] sm:$0xff]  ;;  %v296_v23 = vld [vmem:[%s1115_s6 + $0xa8] sm:$0xff]  ;;  %v295_v25 = vld [vmem:[%s1115_s6 + $0xa0] sm:$0xff] }
  0x21   : > { %v280_v24 = vld [vmem:[%s1115_s6 + $0x28] sm:$0xff]  ;;  %v279_v26 = vld [vmem:[%s1115_s6 + $0x20] sm:$0xff]  ;;  %v294_v27 = vld [vmem:[%s1115_s6 + $0x98] sm:$0xff]  ;;  %vm495_vm5 = vcmp.lt.s32.totalorder %v1241_v40, 700 }
  0x22   : > { %v278_v28 = vld [vmem:[%s1115_s6 + $0x18] sm:$0xff]  ;;  %v293_v29 = vld [vmem:[%s1115_s6 + $0x90] sm:$0xff]  ;;  %v292_v31 = vld [vmem:[%s1115_s6 + $0x88] sm:$0xff] }
  0x23   : > { %870 = vmatpush3.xpose.msk.msra.mxu0 %vm307_vm3, %v288_v6  ;;  %919 = vmatpush3.xpose.msk.msra.mxu1 %vm307_vm3, %v288_v6  ;;  %v277_v30 = vld [vmem:[%s1115_s6 + $0x10] sm:$0xff]  ;;  %v276_v32 = vld [vmem:[%s1115_s6 + $0x8] sm:$0xff]  ;;  %v291_v33 = vld [vmem:[%s1115_s6 + $0x80] sm:$0xff] }
  0x24   : > { %871 = vmatprep.subr.msk.mxu0 %vm307_vm3, %v303_v7  ;;  %904 = vmatprep.subr.msk.mxu1 %vm307_vm3, %v303_v7  ;;  %v275_v34 = vld [vmem:[%s1115_s6] sm:$0xff] }
  0x27   : > { %872 = vmatpush3.xpose.msk.msra.mxu0 %vm307_vm3, %v287_v9  ;;  %920 = vmatpush3.xpose.msk.msra.mxu1 %vm307_vm3, %v287_v9 }
  0x28   : > { %873 = vmatprep.subr.msk.mxu0 %vm307_vm3, %v302_v11  ;;  %905 = vmatprep.subr.msk.mxu1 %vm307_vm3, %v302_v11 }
  0x2b   : > { %874 = vmatpush3.xpose.msk.msra.mxu0 %vm307_vm3, %v286_v12  ;;  %921 = vmatpush3.xpose.msk.msra.mxu1 %vm307_vm3, %v286_v12 }
  0x2c   : > { %875 = vmatprep.subr.msk.mxu0 %vm307_vm3, %v301_v13  ;;  %906 = vmatprep.subr.msk.mxu1 %vm307_vm3, %v301_v13 }
  0x2f   : > { %876 = vmatpush3.xpose.msk.msra.mxu0 %vm307_vm3, %v285_v14  ;;  %922 = vmatpush3.xpose.msk.msra.mxu1 %vm307_vm3, %v285_v14 }
  0x30   : > { %877 = vmatprep.subr.msk.mxu0 %vm307_vm3, %v300_v15  ;;  %907 = vmatprep.subr.msk.mxu1 %vm307_vm3, %v300_v15 }
  0x33   : > { %878 = vmatpush3.xpose.msk.msra.mxu0 %vm307_vm3, %v284_v16  ;;  %923 = vmatpush3.xpose.msk.msra.mxu1 %vm307_vm3, %v284_v16 }
  0x34   : > { %879 = vmatprep.subr.msk.mxu0 %vm307_vm3, %v299_v17  ;;  %908 = vmatprep.subr.msk.mxu1 %vm307_vm3, %v299_v17 }
  0x37   : > { %880 = vmatpush3.xpose.msk.msra.mxu0 %vm307_vm3, %v283_v18  ;;  %924 = vmatpush3.xpose.msk.msra.mxu1 %vm307_vm3, %v283_v18 }
  0x38   : > { %881 = vmatprep.subr.msk.mxu0 %vm307_vm3, %v298_v19  ;;  %909 = vmatprep.subr.msk.mxu1 %vm307_vm3, %v298_v19 }
  0x3b   : > { %882 = vmatpush3.xpose.msk.msra.mxu0 %vm307_vm3, %v282_v20  ;;  %925 = vmatpush3.xpose.msk.msra.mxu1 %vm307_vm3, %v282_v20 }
  0x3c   : > { %883 = vmatprep.subr.msk.mxu0 %vm307_vm3, %v297_v21  ;;  %910 = vmatprep.subr.msk.mxu1 %vm307_vm3, %v297_v21 }
  0x3f   : > { %884 = vmatpush3.xpose.msk.msra.mxu0 %vm307_vm3, %v281_v22  ;;  %926 = vmatpush3.xpose.msk.msra.mxu1 %vm307_vm3, %v281_v22 }
  0x40   : > { %885 = vmatprep.subr.msk.mxu0 %vm307_vm3, %v296_v23  ;;  %911 = vmatprep.subr.msk.mxu1 %vm307_vm3, %v296_v23 }
  0x43   : > { %886 = vmatpush3.xpose.msk.msra.mxu0 %vm307_vm3, %v280_v24  ;;  %927 = vmatpush3.xpose.msk.msra.mxu1 %vm307_vm3, %v280_v24 }
  0x44   : > { %887 = vmatprep.subr.msk.mxu0 %vm307_vm3, %v295_v25  ;;  %912 = vmatprep.subr.msk.mxu1 %vm307_vm3, %v295_v25 }
  0x47   : > { %888 = vmatpush3.xpose.msk.msra.mxu0 %vm307_vm3, %v279_v26  ;;  %928 = vmatpush3.xpose.msk.msra.mxu1 %vm307_vm3, %v279_v26 }
  0x48   : > { %889 = vmatprep.subr.msk.mxu0 %vm307_vm3, %v294_v27  ;;  %913 = vmatprep.subr.msk.mxu1 %vm307_vm3, %v294_v27 }
  0x4b   : > { %890 = vmatpush3.xpose.msk.msra.mxu0 %vm307_vm3, %v278_v28  ;;  %929 = vmatpush3.xpose.msk.msra.mxu1 %vm307_vm3, %v278_v28 }
  0x4c   : > { %891 = vmatprep.subr.msk.mxu0 %vm307_vm3, %v293_v29  ;;  %914 = vmatprep.subr.msk.mxu1 %vm307_vm3, %v293_v29 }
  0x4f   : > { %892 = vmatpush3.xpose.msk.msra.mxu0 %vm307_vm3, %v277_v30  ;;  %930 = vmatpush3.xpose.msk.msra.mxu1 %vm307_vm3, %v277_v30 }
  0x50   : > { %893 = vmatprep.subr.msk.mxu0 %vm307_vm3, %v292_v31  ;;  %915 = vmatprep.subr.msk.mxu1 %vm307_vm3, %v292_v31 }
  0x53   : > { %894 = vmatpush3.xpose.msk.msra.mxu0 %vm307_vm3, %v276_v32  ;;  %931 = vmatpush3.xpose.msk.msra.mxu1 %vm307_vm3, %v276_v32 }
  0x54   : > { %895 = vmatprep.subr.msk.mxu0 %vm307_vm3, %v291_v33  ;;  %916 = vmatprep.subr.msk.mxu1 %vm307_vm3, %v291_v33 }
  0x57   : > { %896 = vmatpush3.xpose.msk.msra.mxu0 %vm307_vm3, %v275_v34  ;;  %932 = vmatpush3.xpose.msk.msra.mxu1 %vm307_vm3, %v275_v34 }
  0x5a   : > { %898 = vmatmul.mubr.msk.f32.vlgmr.msra.gmra.mxu0 %vm307_vm3, %v1145_v8  ;;  %900 = vmatmul.mubr.msk.f32.vlgmr.msra.gmra.mxu1 %vm307_vm3, %v1153_v10 }
 0x118   : > { %498 = sbr.rel (%p861_p10) target bundleno = 443 (0x1bb), region = 44 }
 0x11a   : > { %v1245_v41 = vpop.f32.mrf.mxu0  ;;  %v1247_v42 = vpop.f32.mrf.mxu1 }
 0x11c   : > { %v1249_v43 = vpop.f32.mrf.mxu0  ;;  %v1251_v44 = vpop.f32.mrf.mxu1 }
 0x11d   : > { %v503_v45 = vsel %vm494_vm4, %v1245_v41, 0.0  ;;  %v504_v46 = vsel %vm495_vm5, %v1249_v43, 0.0  ;;  %v505_v47 = vsel %vm494_vm4, %v1247_v42, 0.0  ;;  %v506_v48 = vsel %vm495_vm5, %v1251_v44, 0.0  ;;  %v507_v61 = vld [vmem:[#allocation2] sm:$0xff] }
 0x11e   : > { %v509_v49 = vadd.f32 %v504_v46, %v503_v45  ;;  %vm512_vm6 = vcmask 1041408   ;;  %v526_v50 = vmul.f32 %v503_v45, %v503_v45  ;;  %v527_v51 = vmul.f32 %v504_v46, %v504_v46  ;;  %v508_v0 = vld [vmem:[#allocation2 + $0x8] sm:$0x3] }
 0x11f   : > { %v513_v52 = vsel %vm512_vm6, %v505_v47, 0.0  ;;  %v514_v53 = vsel %vm512_vm6, %v506_v48, 0.0  ;;  %v528_v54 = vmul.f32 %v505_v47, %v505_v47  ;;  %v529_v55 = vmul.f32 %v506_v48, %v506_v48 }
 0x120   : > { %510 = vadd.xlane.f32.xlu0 %v509_v49  ;;  %v515_v56 = vadd.f32 %v514_v53, %v513_v52  ;;  %v530_v57 = vadd.f32 %v527_v51, %v526_v50  ;;  %vm520_vm7 = vcmask 7168   ;;  %vm522_vm8 = vcmask 1024  }
 0x121   : > { %v533_v58 = vsel %vm512_vm6, %v528_v54, 0.0  ;;  %v534_v59 = vsel %vm512_vm6, %v529_v55, 0.0  ;;  %vm540_vm9 = vcmask 15368   ;;  %vm542_vm10 = vcmask 9224  }
 0x122   : > { %531 = vadd.xlane.f32.xlu1 %v530_v57  ;;  %v535_v60 = vadd.f32 %v534_v59, %v533_v58 }
 0x124   : > { %516 = vadd.xlane.f32.xlu0 %v515_v56 }
 0x126   : > { %536 = vadd.xlane.f32.xlu1 %v535_v60 }
 0x1a9   : > { %v511_v62 = vpop.xlane.xlu0 %510 }
 0x1aa   : > { %v518_v63 = vadd.f32 %v511_v62, %v507_v61 }
 0x1ab   : > { %v532_v3 = vpop.xlane.xlu1 %531 }
 0x1ac   : > { %521 = vst.msk [vmem:[#allocation2] sm:$0xff] %vm520_vm7, %v518_v63 }
 0x1ad   : > { %v517_v1 = vpop.xlane.xlu0 %516 }
 0x1ae   : > { %v519_v2 = vadd.f32 %v517_v1, %v508_v0 }
 0x1af   : > { %v537_v6 = vpop.xlane.xlu1 %536 }
 0x1b0   : > { %523 = vst.msk [vmem:[#allocation2 + $0x8] sm:$0x3] %vm522_vm8, %v519_v2 }
 0x1b3   : > { %v524_v4 = vld [vmem:[#allocation2] sm:$0xff] }
 0x1b4   : > { %v538_v5 = vadd.f32 %v532_v3, %v524_v4 }
 0x1b6   : > { %541 = vst.msk [vmem:[#allocation2] sm:$0xff] %vm540_vm9, %v538_v5 }
 0x1b7   : > { %v525_v7 = vld [vmem:[#allocation2 + $0x8] sm:$0x3] }
 0x1b8   : > { %v539_v8 = vadd.f32 %v537_v6, %v525_v7 }
 0x1ba   : > { %543 = vst.msk [vmem:[#allocation2 + $0x8] sm:$0x3] %vm542_vm10, %v539_v8 }
 0x1bb PF: > { %p544_p11 = scmp.eq.s32.totalorder %s1018_s19, 1 }
 0x1bd   : > { %p545_p12 = pnand %p544_p11, %p262_p7 }
 0x1be   : > { %s1033_s15 = smov (!%p545_p12), 1   ;;  %s1034_s16 = smov (!%p545_p12), 127  }
 0x1bf   : > { %548 = sbr.rel (%p545_p12) target bundleno = 833 (0x341), region = 48 }
 0x1c4   : > { %v549_v9 = vld [vmem:[#allocation2] sm:$0xff]  ;;  %v550_v10 = vld [vmem:[#allocation2 + $0x8] sm:$0x3]  ;;  %vm583_vm11 = vcmask 7168   ;;  %vm585_vm12 = vcmask 1024   ;;  %vm601_vm13 = vcmask 15368  }
 0x1c5   : > { %v551_v11 = vmul.f32 0.0014285714, %v549_v9  ;;  %v552_v12 = vmul.f32 0.0014285714, %v550_v10  ;;  %v567_v25 = vld [vmem:[%s1338_s2] sm:$0xff]  ;;  %vm603_vm14 = vcmask 9224  }
 0x1c6   : > { %v568_v28 = vld [vmem:[%s1338_s2 + $0x8] sm:$0x3] }
 0x1c7   : > { %v553_v13 = vmul.f32 %v551_v11, %v551_v11  ;;  %v554_v14 = vmul.f32 %v552_v12, %v552_v12  ;;  %v588_v36 = vld [vmem:[%s1338_s2 + $0x8] sm:$0x3] }
 0x1c9   : > { %557 = vrot.lane.b32.xlu0 %v553_v13, %s1033_s15 }
 0x1cd   : > { %559 = vrot.lane.b32.xlu0 %v554_v14, %s1033_s15 }
 0x23b   : > { %v558_v15 = vpop.permute.xlu0 %557 }
 0x23c   : > { %v563_v16 = vsub.f32 %v551_v11, %v558_v15 }
 0x23e   : > { %v565_v17 = vmax.f32 %v563_v16, 0.0 }
 0x23f   : > { %v560_v18 = vpop.permute.xlu0 %559 }
 0x240   : > { %v569_v19 = vadd.f32 1e-05, %v565_v17  ;;  %v564_v20 = vsub.f32 %v552_v12, %v560_v18 }
 0x242   : > { %982 = vrsqrt.f32 %v569_v19  ;;  %v566_v21 = vmax.f32 %v564_v20, 0.0 }
 0x244   : > { %v570_v22 = vadd.f32 1e-05, %v566_v21 }
 0x246   : > { %984 = vrsqrt.f32 %v570_v22 }
 0x24f   : > { %v983_v23 = vpop.eup %982 }
 0x250   : > { %575 = vrot.lane.b32.xlu1 %v983_v23, %s1034_s16 }
 0x253   : > { %v985_v24 = vpop.eup %984 }
 0x254   : > { %577 = vrot.lane.b32.xlu1 %v985_v24, %s1034_s16 }
 0x2c2   : > { %v576_v26 = vpop.permute.xlu1 %575 }
 0x2c3   : > { %v581_v27 = vmul.f32 %v576_v26, %v567_v25 }
 0x2c5   : > { %584 = vst.msk [vmem:[#allocation4] sm:$0xff] %vm583_vm11, %v581_v27  ;;  %v589_v29 = vmul.f32 %v581_v27, %v551_v11 }
 0x2c6   : > { %v578_v30 = vpop.permute.xlu1 %577 }
 0x2c7   : > { %v582_v31 = vmul.f32 %v578_v30, %v568_v28  ;;  %593 = vrot.lane.b32.xlu0 %v589_v29, %s1033_s15 }
 0x2c9   : > { %586 = vst.msk [vmem:[#allocation4 + $0x8] sm:$0x3] %vm585_vm12, %v582_v31  ;;  %v590_v32 = vmul.f32 %v582_v31, %v552_v12 }
 0x2cb   : > { %595 = vrot.lane.b32.xlu1 %v590_v32, %s1033_s15 }
 0x339   : > { %v594_v33 = vpop.permute.xlu0 %593 }
 0x33a   : > { %v599_v34 = vsub.f32 %v567_v25, %v594_v33 }
 0x33c   : > { %602 = vst.msk [vmem:[#allocation4] sm:$0xff] %vm601_vm13, %v599_v34 }
 0x33d   : > { %v596_v37 = vpop.permute.xlu1 %595 }
 0x33e   : > { %v600_v38 = vsub.f32 %v588_v36, %v596_v37 }
 0x340   : > { %604 = vst.msk [vmem:[#allocation4 + $0x8] sm:$0x3] %vm603_vm14, %v600_v38 }
 0x341 PF: > { %p862_p13 = scmp.ne.s32.totalorder %s1018_s19, 1 }
 0x343   : > { %607 = sbr.rel (%p862_p13) target bundleno = 1146 (0x47a), region = 52 }
 0x348   : > { %v609_v45 = vld [vmem:[#allocation4 + $0x8] sm:$0x3]  ;;  %v1035_v46 = vmov 1   ;;  %v1036_v47 = vmov 0   ;;  %v608_v48 = vld [vmem:[#allocation4] sm:$0xff]  ;;  %v640_v50 = vld [vmem:[%s1338_s2] sm:$0xff] }
 0x349   : > { %987 = vset.pattern.permute.xlu1 %v1035_v46  ;;  %986 = vset.pattern.permute.xlu0 %v1036_v47  ;;  %v641_v49 = vld [vmem:[%s1338_s2 + $0x8] sm:$0x3]  ;;  %v1037_v51 = vmov 2   ;;  %vm656_vm15 = vcmask 1041408   ;;  %v1038_v14 = vmov 1966171168  }
 0x34a   : > { %629 = vperm.xlu1 %987, %v609_v45   ;;  %617 = vperm.xlu0 %986, %v609_v45   ;;  %v677_v15 = vunpack.c.l.s4 %v1038_v14  ;;  %v680_v21 = vshrl.u32 %v487_v35, 7  ;;  %vm693_vm0 = vcmp.lt.s32.totalorder %v487_v35, 256  ;;  %v698_v39 = vld [vmem:[#allocation3] sm:$0x1]  ;;  %vm703_vm1 = vcmask 0  }
 0x34b   : > { %vm712_vm2 = vcmask 8200  }
 0x34c   : > { %v678_v20 = vunpack.c.0.s8 %v677_v15 }
 0x34e   : > { %625 = vperm.xlu1 %987, %v608_v48   ;;  %612 = vperm.xlu0 %986, %v608_v48   ;;  %v681_v26 = vsub.s32 %v678_v20, %v680_v21 }
 0x352   : > { %988 = vset.pattern.permute.xlu0 %v1037_v51  ;;  %989 = vset.pattern.permute.xlu1 %v1037_v51 }
 0x353   : > { %649 = vperm.xlu0 %988, %v641_v49   ;;  %644 = vperm.xlu1 %989, %v640_v50  }
 0x3c5   : > { %v630_v52 = vpop.permute.xlu1 %629  ;;  %v618_v53 = vpop.permute.xlu0 %617 }
 0x3c6   : > { %v622_v54 = vmul.f32 %v618_v53, %v1247_v42  ;;  %v623_v55 = vmul.f32 %v618_v53, %v1251_v44 }
 0x3c8   : > { %v634_v56 = vadd.f32 %v630_v52, %v622_v54  ;;  %v635_v57 = vadd.f32 %v630_v52, %v623_v55 }
 0x3c9   : > { %v613_v58 = vpop.permute.xlu0 %612  ;;  %v626_v59 = vpop.permute.xlu1 %625 }
 0x3ca   : > { %v620_v60 = vmul.f32 %v613_v58, %v1245_v41  ;;  %v621_v61 = vmul.f32 %v613_v58, %v1249_v43  ;;  %v638_v0 = vmax.f32 %v634_v56, 0.0  ;;  %v639_v1 = vmax.f32 %v635_v57, 0.0 }
 0x3cc   : > { %v632_v62 = vadd.f32 %v626_v59, %v620_v60  ;;  %v633_v63 = vadd.f32 %v626_v59, %v621_v61 }
 0x3ce   : > { %v650_v2 = vpop.permute.xlu0 %649  ;;  %v645_v3 = vpop.permute.xlu1 %644  ;;  %v636_v4 = vmax.f32 %v632_v62, 0.0  ;;  %v637_v5 = vmax.f32 %v633_v63, 0.0 }
 0x3cf   : > { %v654_v42 = vmul.f32 %v650_v2, %v638_v0  ;;  %v655_v6 = vmul.f32 %v650_v2, %v639_v1 }
 0x3d0   : > { %v652_v44 = vmul.f32 %v645_v3, %v636_v4  ;;  %v653_v7 = vmul.f32 %v645_v3, %v637_v5 }
 0x3d1   : > { %v657_v8 = vsel %vm656_vm15, %v654_v42, 0.0  ;;  %v665_v9 = vsel %vm656_vm15, %v655_v6, 0.0 }
 0x3d2   : > { %v658_v10 = vadd.f32 %v657_v8, %v652_v44  ;;  %v666_v11 = vadd.f32 %v665_v9, %v653_v7 }
 0x3d4   : > { %v659_v41 = vrot.slane %v658_v10, 4  ;;  %v667_v12 = vrot.slane %v666_v11, 4 }
 0x3d6   : > { %v660_v43 = vadd.f32 %v659_v41, %v658_v10  ;;  %v668_v13 = vadd.f32 %v667_v12, %v666_v11 }
 0x3d8   : > { %v661_v16 = vrot.slane %v660_v43, 2  ;;  %v669_v17 = vrot.slane %v668_v13, 2 }
 0x3da   : > { %v662_v18 = vadd.f32 %v661_v16, %v660_v43  ;;  %v670_v19 = vadd.f32 %v669_v17, %v668_v13 }
 0x3dc   : > { %v663_v22 = vrot.slane %v662_v18, 1  ;;  %v671_v23 = vrot.slane %v670_v19, 1 }
 0x3de   : > { %v664_v24 = vadd.f32 %v663_v22, %v662_v18  ;;  %v672_v25 = vadd.f32 %v671_v23, %v670_v19 }
 0x3e0   : > { %v696_v27 = vsel %vm494_vm4, %v664_v24, 0.0  ;;  %v697_v28 = vsel %vm495_vm5, %v672_v25, 0.0  ;;  %v675_v29 = vcombine.low %v664_v24, %v672_v25 }
 0x3e1   : > { %v699_v30 = vadd.f32 %v697_v28, %v696_v27  ;;  %v706_v31 = vmul.f32 %v696_v27, %v696_v27  ;;  %v707_v32 = vmul.f32 %v697_v28, %v697_v28 }
 0x3e2   : > { %v682_v33 = vrot.slane %v675_v29, %v681_v26 }
 0x3e3   : > { %700 = vadd.xlane.f32.xlu1 %v699_v30  ;;  %v708_v34 = vadd.f32 %v707_v32, %v706_v31 }
 0x3e4   : > { %v689_v36 = vrot.slane %v682_v33, %v681_v26 }
 0x3e5   : > { %709 = vadd.xlane.f32.xlu0 %v708_v34 }
 0x3e6   : > { %695 = vst.msk [vmem:[%s258_s9] sm:$0x3] %vm693_vm0, %v689_v36 }
 0x46c   : > { %v701_v40 = vpop.xlane.xlu1 %700 }
 0x46d   : > { %v702_v37 = vadd.f32 %v701_v40, %v698_v39 }
 0x46e   : > { %v710_v38 = vpop.xlane.xlu0 %709 }
 0x46f   : > { %704 = vst.msk [vmem:[#allocation3] sm:$0x1] %vm703_vm1, %v702_v37 }
 0x476   : > { %v705_v45 = vld [vmem:[#allocation3] sm:$0x1] }
 0x477   : > { %v711_v46 = vadd.f32 %v710_v38, %v705_v45 }
 0x479   : > { %713 = vst.msk [vmem:[#allocation3] sm:$0x1] %vm712_vm2, %v711_v46 }
 0x47a PF: > { %p714_p0 = scmp.eq.s32.totalorder %s1014_s18, 2 }
 0x47c   : > { %p715_p1 = pnand %p714_p0, %p544_p11 }
 0x47d   : > { %s1039_s27 = smov (!%p715_p1), 1   ;;  %s1040_s9 = smov (!%p715_p1), 127  }
 0x47e   : > { %718 = sbr.rel (%p715_p1) target bundleno = 1532 (0x5fc), region = 56 }
 0x483   : > { %v719_v35 = vld [vmem:[#allocation3] sm:$0x1]  ;;  %v728_v54 = vld [vmem:[%s1339_s3] sm:$0x1]  ;;  %vm736_vm3 = vcmask 0   ;;  %vm745_vm4 = vcmask 8200  }
 0x484   : > { %v720_v47 = vmul.f32 0.0014285714, %v719_v35  ;;  %v738_v58 = vld [vmem:[%s1339_s3] sm:$0x1] }
 0x486   : > { %v721_v48 = vmul.f32 %v720_v47, %v720_v47 }
 0x488   : > { %723 = vrot.lane.b32.xlu0 %v721_v48, %s1039_s27 }
 0x4fa   : > { %v724_v49 = vpop.permute.xlu0 %723 }
 0x4fb   : > { %v726_v50 = vsub.f32 %v720_v47, %v724_v49 }
 0x4fd   : > { %v727_v51 = vmax.f32 %v726_v50, 0.0 }
 0x4ff   : > { %v729_v52 = vadd.f32 1e-05, %v727_v51 }
 0x501   : > { %990 = vrsqrt.f32 %v729_v52 }
 0x50e   : > { %v991_v53 = vpop.eup %990 }
 0x50f   : > { %732 = vrot.lane.b32.xlu0 %v991_v53, %s1040_s9 }
 0x581   : > { %v733_v55 = vpop.permute.xlu0 %732 }
 0x582   : > { %v735_v56 = vmul.f32 %v733_v55, %v728_v54 }
 0x584   : > { %737 = vst.msk [vmem:[%s1341_s5] sm:$0x1] %vm736_vm3, %v735_v56  ;;  %v739_v57 = vmul.f32 %v735_v56, %v720_v47 }
 0x586   : > { %741 = vrot.lane.b32.xlu1 %v739_v57, %s1039_s27 }
 0x5f8   : > { %v742_v59 = vpop.permute.xlu1 %741 }
 0x5f9   : > { %v744_v60 = vsub.f32 %v738_v58, %v742_v59 }
 0x5fb   : > { %746 = vst.msk [vmem:[%s1341_s5] sm:$0x1] %vm745_vm4, %v744_v60 }
 0x5fc PF: > { %s16_s22 = sadd.s32 1, %s1030_s22   ;;  %s1342_s18 = smov %s1022_s20 }
 0x5fd   : > { %p13_p2 = scmp.ge.s32.totalorder %s16_s22, 8   ;;  %s1343_s19 = smov %s1026_s21 }
 0x5fe   : > { %s1344_s20 = smov %s1347_s23  ;;  %s1345_s21 = smov %s1351_s24 }
 0x5ff   :  { %15 = sbr.rel (!%p13_p2) target bundleno = 3 (0x3), region = 94 }

</bundles_post_ra>
